<compile_context>
chip_gen: v5e
topology: v5e:2x2
jax: 0.10.0
libtpu: 0.0.40
codegen_flags: <defaults>
</compile_context>

<pallas_src>
import functools

import jax
import jax.numpy as jnp
from jax.experimental import pallas as pl
from jax.experimental.pallas import tpu as pltpu

_HALO = 8  # halo rows on each side of a time tile (sublane aligned, >= K // 2)


def _round_up(n, m):
    return ((n + m - 1) // m) * m


def _conformer_conv_kernel(x_hbm_ref, w1a_ref, b1a_ref, w1g_ref, b1g_ref,
                           wd_ref, bd_ref, gamma_ref, beta_ref, w2_ref, b2_ref,
                           o_ref, x_vmem, dma_sem,
                           *, seq_len, block_t, kernel_size, mxu_dtype):
    T, tT, K = seq_len, block_t, kernel_size
    pad = K // 2
    tTe = tT + 2 * _HALO

    b = pl.program_id(0)
    i = pl.program_id(1)

    # ---- manual DMA of the halo-extended x slab for this time tile ----
    start = pl.multiple_of(i * tT, 8)
    cp = pltpu.make_async_copy(x_hbm_ref.at[b, pl.ds(start, tTe)], x_vmem, dma_sem)
    cp.start()
    cp.wait()
    x_e = x_vmem[...]                                        # (tTe, D) f32

    # ---- pointwise_conv1 (k=1) + GLU: two pre-transposed (D, D) matmuls ----
    xm = x_e.astype(mxu_dtype)
    a = jnp.dot(xm, w1a_ref[...], preferred_element_type=jnp.float32) + b1a_ref[...]
    g = jnp.dot(xm, w1g_ref[...], preferred_element_type=jnp.float32) + b1g_ref[...]
    u = a * jax.nn.sigmoid(g)                                # (tTe, D) f32

    # Zero rows outside the real sequence: matches Conv1d zero padding and
    # kills the bias-only GLU output of the zero-padded rows.
    row = jax.lax.broadcasted_iota(jnp.int32, (tTe, 1), 0)
    gidx = row + (i * tT - _HALO)
    u = jnp.where((gidx >= 0) & (gidx < T), u, 0.0)

    # ---- depthwise Conv1d (groups=D, width K): K XLU rolls + VPU FMAs ----
    wdv = wd_ref[...]                                        # (K, D) f32

    def tap(k):
        s = _HALO - pad + k                                  # out[t] needs u[t + s]
        return wdv[k][None, :] * pltpu.roll(u, shift=(tTe - s) % tTe, axis=0)

    acc = tap(0)
    for k in range(1, K):                                    # static unroll, K small
        acc = acc + tap(k)
    dw = acc[:tT, :] + bd_ref[...]                           # (tT, D), aligned slice

    # ---- LayerNorm over D (eps=1e-5, biased variance) ----
    mu = jnp.mean(dw, axis=-1, keepdims=True)
    var = jnp.mean(jnp.square(dw - mu), axis=-1, keepdims=True)
    y = (dw - mu) * jax.lax.rsqrt(var + 1e-5) * gamma_ref[...] + beta_ref[...]

    # ---- SiLU ----
    s_act = y * jax.nn.sigmoid(y)

    # ---- pointwise_conv2 (k=1) ----
    out = jnp.dot(s_act.astype(mxu_dtype), w2_ref[...],
                  preferred_element_type=jnp.float32) + b2_ref[...]

    # Dropout: identity (eval mode).  # TODO(synk): training-mode dropout omitted.
    o_ref[0] = out.astype(o_ref.dtype)


def conformer_conv_module(x, params, *, kernel_size=7, block_t=512,
                          mxu_dtype=jnp.bfloat16):
    """x: (B, T, D) float32. Returns (B, T, D). Eval-mode forward."""
    B, T, D = x.shape
    if kernel_size % 2 != 1:
        raise ValueError("kernel_size must be odd: PyTorch Conv1d(padding=K//2) "
                         "only preserves the sequence length for odd K.")
    pad = kernel_size // 2
    assert pad <= _HALO, "kernel_size too large for the fixed halo"

    w1, b1, wd, bd, gamma, beta, w2, b2 = params
    f32 = jnp.float32
    # Pre-transpose + split the pointwise weights on the host: the kernel does
    # x @ W with W already (D_in, D_out) and the GLU halves separated, so there
    # is no in-kernel transpose and no (T, 2D) temporary.
    w1a = jnp.asarray(w1[:D, :].T, mxu_dtype)                # (D, D) GLU value half
    w1g = jnp.asarray(w1[D:, :].T, mxu_dtype)                # (D, D) GLU gate half
    w2t = jnp.asarray(w2.T, mxu_dtype)                       # (D, D)
    b1a = jnp.asarray(b1[:D], f32).reshape(1, D)
    b1g = jnp.asarray(b1[D:], f32).reshape(1, D)
    wdk = jnp.asarray(wd, f32).reshape(D, kernel_size).T     # (K, D): taps on sublanes
    bdr = jnp.asarray(bd, f32).reshape(1, D)
    gam = jnp.asarray(gamma, f32).reshape(1, D)
    bet = jnp.asarray(beta, f32).reshape(1, D)
    b2r = jnp.asarray(b2, f32).reshape(1, D)

    # Time-axis tiling (bounded VMEM + deeper pipelining for long sequences).
    tT = _round_up(min(block_t, _round_up(T, 8)), 8)
    nT = pl.cdiv(T, tT)
    Tp = nT * tT
    tTe = tT + 2 * _HALO

    # Zero-padded, halo-extended copy of x in HBM; tile i DMAs rows
    # [i*tT, i*tT + tTe), i.e. x rows [i*tT - HALO, i*tT + tT + HALO).
    x_ext = jnp.zeros((B, Tp + 2 * _HALO, D), x.dtype).at[:, _HALO:_HALO + T, :].set(x)

    kernel = functools.partial(_conformer_conv_kernel, seq_len=T, block_t=tT,
                               kernel_size=kernel_size, mxu_dtype=mxu_dtype)

    def full(shape):
        return pl.BlockSpec(shape, lambda b, i: tuple(0 for _ in shape))

    flops = 6 * B * Tp * D * D + 2 * B * Tp * D * kernel_size
    cost = pl.CostEstimate(flops=int(flops),
                           transcendentals=int(3 * B * Tp * D),
                           bytes_accessed=int(2 * B * Tp * D * 4 + 3 * D * D * 2))

    out = pl.pallas_call(
        kernel,
        out_shape=jax.ShapeDtypeStruct((B, Tp, D), x.dtype),
        grid_spec=pltpu.PrefetchScalarGridSpec(
            num_scalar_prefetch=0,
            grid=(B, nT),
            in_specs=[
                pl.BlockSpec(memory_space=pl.ANY),           # x_ext (HBM, manual halo DMA)
                full((D, D)),                                # w1a (pre-transposed)
                full((1, D)),                                # b1a
                full((D, D)),                                # w1g (pre-transposed)
                full((1, D)),                                # b1g
                full((kernel_size, D)),                      # depthwise taps (K, D)
                full((1, D)),                                # bd
                full((1, D)),                                # gamma
                full((1, D)),                                # beta
                full((D, D)),                                # w2 (pre-transposed)
                full((1, D)),                                # b2
            ],
            out_specs=pl.BlockSpec((1, tT, D), lambda b, i: (b, i, 0)),
            scratch_shapes=[
                pltpu.VMEM((tTe, D), x.dtype),               # halo-extended x tile
                pltpu.SemaphoreType.DMA(()),
            ],
        ),
        compiler_params=pltpu.CompilerParams(
            dimension_semantics=("parallel", "parallel"),
            vmem_limit_bytes=64 * 1024 * 1024,
        ),
        cost_estimate=cost,
    )(x_ext, w1a, b1a, w1g, b1g, wdk, bdr, gam, bet, w2t, b2r)
    return out[:, :T, :]


def _reference(x, params, kernel_size=7, matmul_dtype=jnp.float32):
    """Pure-JAX reference mirroring the PyTorch forward (eval mode)."""
    B, T, D = x.shape
    w1, b1, wd, bd, gamma, beta, w2, b2 = params
    pad = kernel_size // 2
    md = matmul_dtype
    h = jnp.einsum('btd,ed->bte', x.astype(md), w1.astype(md),
                   preferred_element_type=jnp.float32) + b1      # (B, T, 2D)
    a, g = h[..., :D], h[..., D:]
    u = a * jax.nn.sigmoid(g)
    u_pad = jnp.pad(u, ((0, 0), (pad, pad), (0, 0)))
    dw = jnp.zeros((B, T, D), jnp.float32) + bd
    wd2 = wd.reshape(D, kernel_size)
    for k in range(kernel_size):
        dw = dw + wd2[:, k][None, None, :] * u_pad[:, k:k + T, :]
    mu = jnp.mean(dw, axis=-1, keepdims=True)
    var = jnp.mean((dw - mu) ** 2, axis=-1, keepdims=True)
    y = (dw - mu) * jax.lax.rsqrt(var + 1e-5) * gamma + beta
    s = y * jax.nn.sigmoid(y)
    return jnp.einsum('btd,ed->bte', s.astype(md), w2.astype(md),
                      preferred_element_type=jnp.float32) + b2


if __name__ == "__main__":
    B, T, D, K = 2, 16, 32, 7

    key = jax.random.PRNGKey(0)
    ks = jax.random.split(key, 9)
    scale = 0.1
    w1 = scale * jax.random.normal(ks[0], (2 * D, D), jnp.float32)   # Conv1d(D, 2D, 1).weight[:, :, 0]
    b1 = scale * jax.random.normal(ks[1], (2 * D,), jnp.float32)
    wd = scale * jax.random.normal(ks[2], (D, 1, K), jnp.float32)    # depthwise Conv1d weight
    bd = scale * jax.random.normal(ks[3], (D,), jnp.float32)
    gamma = 1.0 + scale * jax.random.normal(ks[4], (D,), jnp.float32)
    beta = scale * jax.random.normal(ks[5], (D,), jnp.float32)
    w2 = scale * jax.random.normal(ks[6], (D, D), jnp.float32)       # Conv1d(D, D, 1).weight[:, :, 0]
    b2 = scale * jax.random.normal(ks[7], (D,), jnp.float32)
    x = jax.random.normal(ks[8], (B, T, D), jnp.float32)

    params = (w1, b1, wd, bd, gamma, beta, w2, b2)

    # 1) exact-math check: f32 MXU path vs f32 reference (tight tolerance).
    out_f32 = jax.block_until_ready(
        conformer_conv_module(x, params, kernel_size=K, mxu_dtype=jnp.float32))
    ref_f32 = jax.block_until_ready(_reference(x, params, kernel_size=K))
    assert out_f32.shape == (B, T, D)
    assert jnp.allclose(out_f32, ref_f32, rtol=1e-4, atol=1e-4), \
        float(jnp.max(jnp.abs(out_f32 - ref_f32)))

    # 2) fast path: bf16 MXU operands (elementwise math stays f32) vs the
    #    reference with the same bf16 operand rounding.
    out_bf16 = jax.block_until_ready(
        conformer_conv_module(x, params, kernel_size=K, mxu_dtype=jnp.bfloat16))
    ref_bf16 = jax.block_until_ready(
        _reference(x, params, kernel_size=K, matmul_dtype=jnp.bfloat16))
    assert jnp.allclose(out_bf16, ref_bf16, rtol=1e-2, atol=1e-2), \
        float(jnp.max(jnp.abs(out_bf16 - ref_bf16)))

    print("KERNEL_OK")
</pallas_src>

<mosaic_0001>
module attributes {stable_mosaic.version = 11 : i64} {
  func.func @_conformer_conv_kernel(%arg0: i32, %arg1: i32, %arg2: memref<2x32x32xf32, #tpu.memory_space<any>>, %arg3: memref<32x32xf32, #tpu.memory_space<vmem>>, %arg4: memref<1x32xf32, #tpu.memory_space<vmem>>, %arg5: memref<32x32xf32, #tpu.memory_space<vmem>>, %arg6: memref<1x32xf32, #tpu.memory_space<vmem>>, %arg7: memref<7x32xf32, #tpu.memory_space<vmem>>, %arg8: memref<1x32xf32, #tpu.memory_space<vmem>>, %arg9: memref<1x32xf32, #tpu.memory_space<vmem>>, %arg10: memref<1x32xf32, #tpu.memory_space<vmem>>, %arg11: memref<32x32xf32, #tpu.memory_space<vmem>>, %arg12: memref<1x32xf32, #tpu.memory_space<vmem>>, %arg13: memref<1x16x32xf32, #tpu.memory_space<vmem>>, %arg14: memref<32x32xf32, #tpu.memory_space<vmem>>, %arg15: memref<!tpu.dma_semaphore, #tpu.memory_space<semaphore_mem>>) attributes {dimension_semantics = [#tpu.dimension_semantics<parallel>, #tpu.dimension_semantics<parallel>], iteration_bounds = array<i64: 2, 1>, scalar_prefetch = 0 : i64, scratch_operands = 2 : i64, tpu.core_type = #tpu.core_type<tc>, window_params = [{}, {pipeline_mode = #tpu.pipeline_mode<synchronous>, transform_indices = @transform_1, window_bounds = array<i64: 32, 32>}, {pipeline_mode = #tpu.pipeline_mode<synchronous>, transform_indices = @transform_2, window_bounds = array<i64: 1, 32>}, {pipeline_mode = #tpu.pipeline_mode<synchronous>, transform_indices = @transform_3, window_bounds = array<i64: 32, 32>}, {pipeline_mode = #tpu.pipeline_mode<synchronous>, transform_indices = @transform_4, window_bounds = array<i64: 1, 32>}, {pipeline_mode = #tpu.pipeline_mode<synchronous>, transform_indices = @transform_5, window_bounds = array<i64: 7, 32>}, {pipeline_mode = #tpu.pipeline_mode<synchronous>, transform_indices = @transform_6, window_bounds = array<i64: 1, 32>}, {pipeline_mode = #tpu.pipeline_mode<synchronous>, transform_indices = @transform_7, window_bounds = array<i64: 1, 32>}, {pipeline_mode = #tpu.pipeline_mode<synchronous>, transform_indices = @transform_8, window_bounds = array<i64: 1, 32>}, {pipeline_mode = #tpu.pipeline_mode<synchronous>, transform_indices = @transform_9, window_bounds = array<i64: 32, 32>}, {pipeline_mode = #tpu.pipeline_mode<synchronous>, transform_indices = @transform_10, window_bounds = array<i64: 1, 32>}, {transform_indices = @transform_11, window_bounds = array<i64: 1, 16, 32>}]} {
    %c16_i32 = arith.constant 16 : i32
    %0 = arith.muli %arg1, %c16_i32 : i32
    %1 = tpu.assume_multiple %0, 8 : i32
    %c0_i32 = arith.constant 0 : i32
    %2 = tpu.memref_slice %arg2[%arg0, %1, %c0_i32] : memref<2x32x32xf32, #tpu.memory_space<any>> -> memref<1x32x32xf32, #tpu.memory_space<any>>
    %3 = tpu.memref_squeeze %2 : memref<1x32x32xf32, #tpu.memory_space<any>> -> memref<32x32xf32, #tpu.memory_space<any>>
    tpu.enqueue_dma source(%3 : memref<32x32xf32, #tpu.memory_space<any>>) target(%arg14 : memref<32x32xf32, #tpu.memory_space<vmem>>) target_semaphore(%arg15 : memref<!tpu.dma_semaphore, #tpu.memory_space<semaphore_mem>>)
    %c0_i32_0 = arith.constant 0 : i32
    %4 = tpu.memref_slice %arg2[%arg0, %1, %c0_i32_0] : memref<2x32x32xf32, #tpu.memory_space<any>> -> memref<1x32x32xf32, #tpu.memory_space<any>>
    %5 = tpu.memref_squeeze %4 : memref<1x32x32xf32, #tpu.memory_space<any>> -> memref<32x32xf32, #tpu.memory_space<any>>
    tpu.wait_dma2 semaphore(%arg15 : memref<!tpu.dma_semaphore, #tpu.memory_space<semaphore_mem>>) src(%5 : memref<32x32xf32, #tpu.memory_space<any>>) dst(%arg14 : memref<32x32xf32, #tpu.memory_space<vmem>>)
    %c0 = arith.constant 0 : index
    %c0_1 = arith.constant 0 : index
    %6 = vector.load %arg14[%c0, %c0_1] : memref<32x32xf32, #tpu.memory_space<vmem>>, vector<32x32xf32>
    %c0_2 = arith.constant 0 : index
    %c0_3 = arith.constant 0 : index
    %7 = vector.load %arg3[%c0_2, %c0_3] : memref<32x32xf32, #tpu.memory_space<vmem>>, vector<32x32xf32>
    %cst = arith.constant dense<0.000000e+00> : vector<32x32xf32>
    %8 = tpu.matmul %6, %7, %cst {dimension_numbers = #tpu.dot_dimension_numbers<[1], [0], [0], [1], [0, 0, 1, 1], [], []>} : vector<32x32xf32>, vector<32x32xf32>, vector<32x32xf32> -> vector<32x32xf32>
    %c0_4 = arith.constant 0 : index
    %c0_5 = arith.constant 0 : index
    %9 = vector.load %arg4[%c0_4, %c0_5] : memref<1x32xf32, #tpu.memory_space<vmem>>, vector<1x32xf32>
    %10 = vector.broadcast %9 : vector<1x32xf32> to vector<32x32xf32>
    %11 = arith.addf %8, %10 : vector<32x32xf32>
    %c0_6 = arith.constant 0 : index
    %c0_7 = arith.constant 0 : index
    %12 = vector.load %arg5[%c0_6, %c0_7] : memref<32x32xf32, #tpu.memory_space<vmem>>, vector<32x32xf32>
    %cst_8 = arith.constant dense<0.000000e+00> : vector<32x32xf32>
    %13 = tpu.matmul %6, %12, %cst_8 {dimension_numbers = #tpu.dot_dimension_numbers<[1], [0], [0], [1], [0, 0, 1, 1], [], []>} : vector<32x32xf32>, vector<32x32xf32>, vector<32x32xf32> -> vector<32x32xf32>
    %c0_9 = arith.constant 0 : index
    %c0_10 = arith.constant 0 : index
    %14 = vector.load %arg6[%c0_9, %c0_10] : memref<1x32xf32, #tpu.memory_space<vmem>>, vector<1x32xf32>
    %15 = vector.broadcast %14 : vector<1x32xf32> to vector<32x32xf32>
    %16 = arith.addf %13, %15 : vector<32x32xf32>
    %17 = arith.negf %16 : vector<32x32xf32>
    %18 = math.exp %17 : vector<32x32xf32>
    %cst_11 = arith.constant 1.000000e+00 : f32
    %19 = vector.broadcast %cst_11 : f32 to vector<32x32xf32>
    %20 = arith.addf %19, %18 : vector<32x32xf32>
    %21 = arith.divf %19, %20 : vector<32x32xf32>
    %22 = arith.mulf %11, %21 : vector<32x32xf32>
    %23 = tpu.iota {dimensions = array<i32: 0>} : vector<32x1xi32>
    %c16_i32_12 = arith.constant 16 : i32
    %24 = arith.muli %arg1, %c16_i32_12 : i32
    %c8_i32 = arith.constant 8 : i32
    %25 = arith.subi %24, %c8_i32 : i32
    %26 = vector.broadcast %25 : i32 to vector<32x1xi32>
    %27 = arith.addi %23, %26 : vector<32x1xi32>
    %c0_i32_13 = arith.constant 0 : i32
    %28 = vector.broadcast %c0_i32_13 : i32 to vector<32x1xi32>
    %29 = arith.cmpi sge, %27, %28 : vector<32x1xi32>
    %c16_i32_14 = arith.constant 16 : i32
    %30 = vector.broadcast %c16_i32_14 : i32 to vector<32x1xi32>
    %31 = arith.cmpi slt, %27, %30 : vector<32x1xi32>
    %32 = arith.andi %29, %31 : vector<32x1xi1>
    %cst_15 = arith.constant 0.000000e+00 : f32
    %33 = vector.shape_cast %32 : vector<32x1xi1> to vector<32x1xi1>
    %34 = vector.broadcast %33 : vector<32x1xi1> to vector<32x32xi1>
    %35 = vector.broadcast %cst_15 : f32 to vector<32x32xf32>
    %36 = arith.select %34, %22, %35 : vector<32x32xi1>, vector<32x32xf32>
    %c0_16 = arith.constant 0 : index
    %c0_17 = arith.constant 0 : index
    %37 = vector.load %arg7[%c0_16, %c0_17] : memref<7x32xf32, #tpu.memory_space<vmem>>, vector<7x32xf32>
    %38 = vector.extract_strided_slice %37 {offsets = [0, 0], sizes = [1, 32], strides = [1, 1]} : vector<7x32xf32> to vector<1x32xf32>
    %39 = vector.shape_cast %38 : vector<1x32xf32> to vector<32xf32>
    %40 = vector.shape_cast %39 : vector<32xf32> to vector<1x32xf32>
    %c27_i32 = arith.constant 27 : i32
    %41 = tpu.dynamic_rotate %36 by %c27_i32 dim 0 : vector<32x32xf32>, i32 -> vector<32x32xf32>
    %42 = vector.broadcast %40 : vector<1x32xf32> to vector<32x32xf32>
    %43 = arith.mulf %42, %41 : vector<32x32xf32>
    %44 = vector.extract_strided_slice %37 {offsets = [1, 0], sizes = [1, 32], strides = [1, 1]} : vector<7x32xf32> to vector<1x32xf32>
    %45 = vector.shape_cast %44 : vector<1x32xf32> to vector<32xf32>
    %46 = vector.shape_cast %45 : vector<32xf32> to vector<1x32xf32>
    %c26_i32 = arith.constant 26 : i32
    %47 = tpu.dynamic_rotate %36 by %c26_i32 dim 0 : vector<32x32xf32>, i32 -> vector<32x32xf32>
    %48 = vector.broadcast %46 : vector<1x32xf32> to vector<32x32xf32>
    %49 = arith.mulf %48, %47 : vector<32x32xf32>
    %50 = arith.addf %43, %49 : vector<32x32xf32>
    %51 = vector.extract_strided_slice %37 {offsets = [2, 0], sizes = [1, 32], strides = [1, 1]} : vector<7x32xf32> to vector<1x32xf32>
    %52 = vector.shape_cast %51 : vector<1x32xf32> to vector<32xf32>
    %53 = vector.shape_cast %52 : vector<32xf32> to vector<1x32xf32>
    %c25_i32 = arith.constant 25 : i32
    %54 = tpu.dynamic_rotate %36 by %c25_i32 dim 0 : vector<32x32xf32>, i32 -> vector<32x32xf32>
    %55 = vector.broadcast %53 : vector<1x32xf32> to vector<32x32xf32>
    %56 = arith.mulf %55, %54 : vector<32x32xf32>
    %57 = arith.addf %50, %56 : vector<32x32xf32>
    %58 = vector.extract_strided_slice %37 {offsets = [3, 0], sizes = [1, 32], strides = [1, 1]} : vector<7x32xf32> to vector<1x32xf32>
    %59 = vector.shape_cast %58 : vector<1x32xf32> to vector<32xf32>
    %60 = vector.shape_cast %59 : vector<32xf32> to vector<1x32xf32>
    %c24_i32 = arith.constant 24 : i32
    %61 = tpu.dynamic_rotate %36 by %c24_i32 dim 0 : vector<32x32xf32>, i32 -> vector<32x32xf32>
    %62 = vector.broadcast %60 : vector<1x32xf32> to vector<32x32xf32>
    %63 = arith.mulf %62, %61 : vector<32x32xf32>
    %64 = arith.addf %57, %63 : vector<32x32xf32>
    %65 = vector.extract_strided_slice %37 {offsets = [4, 0], sizes = [1, 32], strides = [1, 1]} : vector<7x32xf32> to vector<1x32xf32>
    %66 = vector.shape_cast %65 : vector<1x32xf32> to vector<32xf32>
    %67 = vector.shape_cast %66 : vector<32xf32> to vector<1x32xf32>
    %c23_i32 = arith.constant 23 : i32
    %68 = tpu.dynamic_rotate %36 by %c23_i32 dim 0 : vector<32x32xf32>, i32 -> vector<32x32xf32>
    %69 = vector.broadcast %67 : vector<1x32xf32> to vector<32x32xf32>
    %70 = arith.mulf %69, %68 : vector<32x32xf32>
    %71 = arith.addf %64, %70 : vector<32x32xf32>
    %72 = vector.extract_strided_slice %37 {offsets = [5, 0], sizes = [1, 32], strides = [1, 1]} : vector<7x32xf32> to vector<1x32xf32>
    %73 = vector.shape_cast %72 : vector<1x32xf32> to vector<32xf32>
    %74 = vector.shape_cast %73 : vector<32xf32> to vector<1x32xf32>
    %c22_i32 = arith.constant 22 : i32
    %75 = tpu.dynamic_rotate %36 by %c22_i32 dim 0 : vector<32x32xf32>, i32 -> vector<32x32xf32>
    %76 = vector.broadcast %74 : vector<1x32xf32> to vector<32x32xf32>
    %77 = arith.mulf %76, %75 : vector<32x32xf32>
    %78 = arith.addf %71, %77 : vector<32x32xf32>
    %79 = vector.extract_strided_slice %37 {offsets = [6, 0], sizes = [1, 32], strides = [1, 1]} : vector<7x32xf32> to vector<1x32xf32>
    %80 = vector.shape_cast %79 : vector<1x32xf32> to vector<32xf32>
    %81 = vector.shape_cast %80 : vector<32xf32> to vector<1x32xf32>
    %c21_i32 = arith.constant 21 : i32
    %82 = tpu.dynamic_rotate %36 by %c21_i32 dim 0 : vector<32x32xf32>, i32 -> vector<32x32xf32>
    %83 = vector.broadcast %81 : vector<1x32xf32> to vector<32x32xf32>
    %84 = arith.mulf %83, %82 : vector<32x32xf32>
    %85 = arith.addf %78, %84 : vector<32x32xf32>
    %86 = vector.extract_strided_slice %85 {offsets = [0, 0], sizes = [16, 32], strides = [1, 1]} : vector<32x32xf32> to vector<16x32xf32>
    %c0_18 = arith.constant 0 : index
    %c0_19 = arith.constant 0 : index
    %87 = vector.load %arg8[%c0_18, %c0_19] : memref<1x32xf32, #tpu.memory_space<vmem>>, vector<1x32xf32>
    %88 = vector.broadcast %87 : vector<1x32xf32> to vector<16x32xf32>
    %89 = arith.addf %86, %88 : vector<16x32xf32>
    %cst_20 = arith.constant dense<0.000000e+00> : vector<16xf32>
    %90 = vector.multi_reduction <add>, %89, %cst_20 [1] : vector<16x32xf32> to vector<16xf32>
    %91 = vector.shape_cast %90 : vector<16xf32> to vector<16x1xf32>
    %cst_21 = arith.constant 3.200000e+01 : f32
    %92 = vector.broadcast %cst_21 : f32 to vector<16x1xf32>
    %93 = arith.divf %91, %92 : vector<16x1xf32>
    %94 = vector.broadcast %93 : vector<16x1xf32> to vector<16x32xf32>
    %95 = arith.subf %89, %94 : vector<16x32xf32>
    %96 = arith.mulf %95, %95 : vector<16x32xf32>
    %cst_22 = arith.constant dense<0.000000e+00> : vector<16xf32>
    %97 = vector.multi_reduction <add>, %96, %cst_22 [1] : vector<16x32xf32> to vector<16xf32>
    %98 = vector.shape_cast %97 : vector<16xf32> to vector<16x1xf32>
    %cst_23 = arith.constant 3.200000e+01 : f32
    %99 = vector.broadcast %cst_23 : f32 to vector<16x1xf32>
    %100 = arith.divf %98, %99 : vector<16x1xf32>
    %101 = vector.broadcast %93 : vector<16x1xf32> to vector<16x32xf32>
    %102 = arith.subf %89, %101 : vector<16x32xf32>
    %cst_24 = arith.constant 9.99999974E-6 : f32
    %103 = vector.broadcast %cst_24 : f32 to vector<16x1xf32>
    %104 = arith.addf %100, %103 : vector<16x1xf32>
    %105 = math.rsqrt %104 : vector<16x1xf32>
    %106 = vector.broadcast %105 : vector<16x1xf32> to vector<16x32xf32>
    %107 = arith.mulf %102, %106 : vector<16x32xf32>
    %c0_25 = arith.constant 0 : index
    %c0_26 = arith.constant 0 : index
    %108 = vector.load %arg9[%c0_25, %c0_26] : memref<1x32xf32, #tpu.memory_space<vmem>>, vector<1x32xf32>
    %109 = vector.broadcast %108 : vector<1x32xf32> to vector<16x32xf32>
    %110 = arith.mulf %107, %109 : vector<16x32xf32>
    %c0_27 = arith.constant 0 : index
    %c0_28 = arith.constant 0 : index
    %111 = vector.load %arg10[%c0_27, %c0_28] : memref<1x32xf32, #tpu.memory_space<vmem>>, vector<1x32xf32>
    %112 = vector.broadcast %111 : vector<1x32xf32> to vector<16x32xf32>
    %113 = arith.addf %110, %112 : vector<16x32xf32>
    %114 = arith.negf %113 : vector<16x32xf32>
    %115 = math.exp %114 : vector<16x32xf32>
    %cst_29 = arith.constant 1.000000e+00 : f32
    %116 = vector.broadcast %cst_29 : f32 to vector<16x32xf32>
    %117 = arith.addf %116, %115 : vector<16x32xf32>
    %118 = arith.divf %116, %117 : vector<16x32xf32>
    %119 = arith.mulf %113, %118 : vector<16x32xf32>
    %c0_30 = arith.constant 0 : index
    %c0_31 = arith.constant 0 : index
    %120 = vector.load %arg11[%c0_30, %c0_31] : memref<32x32xf32, #tpu.memory_space<vmem>>, vector<32x32xf32>
    %cst_32 = arith.constant dense<0.000000e+00> : vector<16x32xf32>
    %121 = tpu.matmul %119, %120, %cst_32 {dimension_numbers = #tpu.dot_dimension_numbers<[1], [0], [0], [1], [0, 0, 1, 1], [], []>} : vector<16x32xf32>, vector<32x32xf32>, vector<16x32xf32> -> vector<16x32xf32>
    %c0_33 = arith.constant 0 : index
    %c0_34 = arith.constant 0 : index
    %122 = vector.load %arg12[%c0_33, %c0_34] : memref<1x32xf32, #tpu.memory_space<vmem>>, vector<1x32xf32>
    %123 = vector.broadcast %122 : vector<1x32xf32> to vector<16x32xf32>
    %124 = arith.addf %121, %123 : vector<16x32xf32>
    %c0_35 = arith.constant 0 : index
    %c0_36 = arith.constant 0 : index
    %c0_37 = arith.constant 0 : index
    %125 = vector.load %arg13[%c0_35, %c0_36, %c0_37] : memref<1x16x32xf32, #tpu.memory_space<vmem>>, vector<1x16x32xf32>
    %126 = vector.shape_cast %125 : vector<1x16x32xf32> to vector<16x32xf32>
    %127 = vector.shape_cast %124 : vector<16x32xf32> to vector<1x16x32xf32>
    tpu.vector_store %arg13[%c0_35, %c0_36, %c0_37], %127 {strides = array<i32>} : memref<1x16x32xf32, #tpu.memory_space<vmem>>, vector<1x16x32xf32>,
    return
  }
  func.func @transform_1(%arg0: i32, %arg1: i32) -> (i32, i32) {
    %c0_i32 = arith.constant 0 : i32
    %c0_i32_0 = arith.constant 0 : i32
    %c0_i32_1 = arith.constant 0 : i32
    return %c0_i32, %c0_i32_0 : i32, i32
  }
  func.func @transform_2(%arg0: i32, %arg1: i32) -> (i32, i32) {
    %c0_i32 = arith.constant 0 : i32
    %c0_i32_0 = arith.constant 0 : i32
    %c0_i32_1 = arith.constant 0 : i32
    return %c0_i32, %c0_i32_0 : i32, i32
  }
  func.func @transform_3(%arg0: i32, %arg1: i32) -> (i32, i32) {
    %c0_i32 = arith.constant 0 : i32
    %c0_i32_0 = arith.constant 0 : i32
    %c0_i32_1 = arith.constant 0 : i32
    return %c0_i32, %c0_i32_0 : i32, i32
  }
  func.func @transform_4(%arg0: i32, %arg1: i32) -> (i32, i32) {
    %c0_i32 = arith.constant 0 : i32
    %c0_i32_0 = arith.constant 0 : i32
    %c0_i32_1 = arith.constant 0 : i32
    return %c0_i32, %c0_i32_0 : i32, i32
  }
  func.func @transform_5(%arg0: i32, %arg1: i32) -> (i32, i32) {
    %c0_i32 = arith.constant 0 : i32
    %c0_i32_0 = arith.constant 0 : i32
    %c0_i32_1 = arith.constant 0 : i32
    return %c0_i32, %c0_i32_0 : i32, i32
  }
  func.func @transform_6(%arg0: i32, %arg1: i32) -> (i32, i32) {
    %c0_i32 = arith.constant 0 : i32
    %c0_i32_0 = arith.constant 0 : i32
    %c0_i32_1 = arith.constant 0 : i32
    return %c0_i32, %c0_i32_0 : i32, i32
  }
  func.func @transform_7(%arg0: i32, %arg1: i32) -> (i32, i32) {
    %c0_i32 = arith.constant 0 : i32
    %c0_i32_0 = arith.constant 0 : i32
    %c0_i32_1 = arith.constant 0 : i32
    return %c0_i32, %c0_i32_0 : i32, i32
  }
  func.func @transform_8(%arg0: i32, %arg1: i32) -> (i32, i32) {
    %c0_i32 = arith.constant 0 : i32
    %c0_i32_0 = arith.constant 0 : i32
    %c0_i32_1 = arith.constant 0 : i32
    return %c0_i32, %c0_i32_0 : i32, i32
  }
  func.func @transform_9(%arg0: i32, %arg1: i32) -> (i32, i32) {
    %c0_i32 = arith.constant 0 : i32
    %c0_i32_0 = arith.constant 0 : i32
    %c0_i32_1 = arith.constant 0 : i32
    return %c0_i32, %c0_i32_0 : i32, i32
  }
  func.func @transform_10(%arg0: i32, %arg1: i32) -> (i32, i32) {
    %c0_i32 = arith.constant 0 : i32
    %c0_i32_0 = arith.constant 0 : i32
    %c0_i32_1 = arith.constant 0 : i32
    return %c0_i32, %c0_i32_0 : i32, i32
  }
  func.func @transform_11(%arg0: i32, %arg1: i32) -> (i32, i32, i32) {
    %c0_i32 = arith.constant 0 : i32
    %c0_i32_0 = arith.constant 0 : i32
    return %arg0, %arg1, %c0_i32 : i32, i32, i32
  }
}

</mosaic_0001>

<bundles_post_ra>
// kernel: tpu_custom_call.1
= control target key start
LH: loop header
LB: loop body
LE: loop exit
PB: predicated region body
PF: predicated region fallthrough
CT: control target
= control target key end

     0   :  { %s1721_s0 = inlined_call_operand.hbm [shape: f32[2,32,32], index: 0, kind: input, shape index: {}]   ;;  %s1722_s1 = inlined_call_operand.hbm [shape: f32[32,32], index: 1, kind: input, shape index: {}]   ;;  %s1723_s2 = inlined_call_operand.vmem [shape: f32[1,32], index: 2, kind: input, shape index: {}]   ;;  %s1724_s3 = inlined_call_operand.hbm [shape: f32[32,32], index: 3, kind: input, shape index: {}]   ;;  %s1725_s4 = inlined_call_operand.vmem [shape: f32[1,32], index: 4, kind: input, shape index: {}]   ;;  %s1726_s5 = inlined_call_operand.hbm [shape: f32[7,32], index: 5, kind: input, shape index: {}]   ;;  %s1727_s6 = inlined_call_operand.vmem [shape: f32[1,32], index: 6, kind: input, shape index: {}]   ;;  %s1728_s7 = inlined_call_operand.vmem [shape: f32[1,32], index: 7, kind: input, shape index: {}]   ;;  %s1729_s8 = inlined_call_operand.vmem [shape: f32[1,32], index: 8, kind: input, shape index: {}]   ;;  %s1730_s9 = inlined_call_operand.hbm [shape: f32[32,32], index: 9, kind: input, shape index: {}]   ;;  %s1731_s10 = inlined_call_operand.vmem [shape: f32[1,32], index: 10, kind: input, shape index: {}]   ;;  %s1732_s11 = inlined_call_operand.hbm [shape: f32[2,16,32], index: 11, kind: output, shape index: {}]  }
   0x1   :  { %1741 = sst [smem:[#allocation29_spill]] %s1724_s3 }
   0x2   :  { %1742 = sst [smem:[#allocation30_spill]] %s1732_s11 }
   0x3   :  { %16 = vsyncpa [#allocation5], 0 }
   0x4   :  { %17 = vsyncpa [#allocation8], 0 }
   0x5   :  { %18 = vsyncpa [#allocation11], 0 }
   0x6   :  { %19 = vsyncpa [#allocation6], 0 }
   0x7   :  { %21 = vsyncpa [#allocation6 + $0x1], 0  ;;  %s1478_s17 = smov 0   ;;  %s1480_s18 = smov 0  }
   0x8   :  { %s1482_s19 = smov 0   ;;  %s1484_s20 = smov 0  }
   0x9   :  { %s1486_s21 = smov 0   ;;  %s1488_s22 = smov 0  }
   0xa LB: > { %1743 = sst [smem:[#allocation22_spill]] %s1385_s17  ;;  %s993_s23 = sadd.s32 4294967295, %s1405_s22   ;;  %s1405_s22 = sphi %s1488_s22, %s27_s22   ;;  %s1401_s21 = sphi %s1486_s21, %s1763_s21   ;;  %s1397_s20 = sphi %s1484_s20, %s1762_s20   ;;  %s1393_s19 = sphi %s1482_s19, %s1761_s19   ;;  %s1389_s18 = sphi %s1480_s18, %s1765_s18   ;;  %s1385_s17 = sphi %s1478_s17, %s1764_s17  }
   0xb   : > { %1744 = sst [smem:[#allocation23_spill]] %s1393_s19  ;;  %s994_s24 = sadd.s32 4294967294, %s1405_s22  }
   0xc   : > { %1745 = sst [smem:[#allocation24_spill]] %s1401_s21  ;;  %s39_s25 = sadd.s32 1, %s1401_s21 }
   0xd   : > { %1746 = sst [smem:[#allocation25_spill]] %s1405_s22  ;;  %s258_s26 = sadd.s32 1, %s1393_s19 }
   0xe   : > { %p41_p0 = scmp.ge.s32.totalorder %s39_s25, 2  ;;  %p268_p1 = scmp.ne.s32.totalorder %s1393_s19, %s1389_s18 }
   0xf   : > { %p269_p2 = scmp.eq.s32.totalorder %s993_s23, 1  ;;  %p274_p3 = scmp.ne.s32.totalorder %s1389_s18, %s1385_s17 }
  0x10   : > { %s1767_s25 = smov (%p41_p0, %s39_s25), 0  ;;  %p275_p5 = scmp.eq.s32.totalorder %s994_s24, 1 }
  0x11   : > { %1747 = sst [smem:[#allocation26_spill]] %s1767_s25  ;;  %p1518_p4 = por %p269_p2, %p268_p1 }
  0x12   : > { %s253_s28 = ssub.s32 %s1401_s21, %s1767_s25  ;;  %p995_p6 = scmp.ge.s32.totalorder %s1405_s22, 1 }
  0x13   : > { %p256_p7 = scmp.eq.s32.totalorder %s253_s28, 0  ;;  %p1525_p8 = por %p275_p5, %p274_p3 }
  0x14   : > { %p282_p9 = scmp.lt.s32.totalorder %s1405_s22, 3  ;;  %p1537_p11 = scmp.eq.s32.totalorder %s993_s23, 0 }
  0x15   : > { %s1749_s29 = scalar_select %p1525_p8, 1, 0 }
  0x16   : > { %s1531_s30 = scalar_select %p256_p7, %s1393_s19, %s258_s26  }
  0x17   : > { %1750 = sst [smem:[#allocation27_spill]] %s1749_s29  ;;  %p1533_p10 = pnand %p995_p6, %p282_p9 }
  0x18   : > { %1751 = sst [smem:[#allocation28_spill]] %s1531_s30  ;;  %s1407_s26 = smov [#allocation7]  }
  0x19   : > { %p1056_p12 = pneg %p1533_p10  ;;  %s1754_s3 = sld [smem:[#allocation29_spill]] }
  0x1a   : > { %s312_s23 = sshll.u32 %s1407_s26, 4  ;;  %s1408_s28 = smov 128   ;;  %s313_s23 = int_to_ptr.vmem [resolvable:$true] %s312_s23 }
  0x1b   : > { %p1548_p13 = pnand %p1537_p11, %p1056_p12  ;;  %s1409_s25 = smov 8  }
  0x1c   : > { %s293_s14 = sshll.u32 %s1722_s1, 4  ;;  %s1410_s15 = smov [#allocation4]   ;;  %s294_s14 = int_to_ptr.hbm [resolvable:$true] %s293_s14 }
  0x1d   : > { %s328_s17 = sshll.u32 %s1726_s5, 4  ;;  %s1411_s26 = smov [#allocation9]   ;;  %s329_s17 = int_to_ptr.hbm [resolvable:$true] %s328_s17 }
  0x1e   : > { %s330_s22 = sshll.u32 %s1411_s26, 4  ;;  %s1412_s21 = smov [#allocation10]   ;;  %s331_s22 = int_to_ptr.vmem [resolvable:$true] %s330_s22 }
  0x1f   : > { %s310_s16 = sshll.u32 %s1754_s3, 4  ;;  %s295_s3 = sshll.u32 %s1410_s15, 4  ;;  %s311_s16 = int_to_ptr.hbm [resolvable:$true] %s310_s16  ;;  %s296_s3 = int_to_ptr.vmem [resolvable:$true] %s295_s3 }
  0x20   : > { %1062 = dma.hbm_to_vmem [thread:$0]  (!%p1548_p13), %s311_s16, 512, %s313_s23, [#allocation8], %s1408_s28, %s1408_s28, %s1409_s25  }
  0x21   : > { %1059 = dma.hbm_to_vmem [thread:$0]  (!%p1548_p13), %s294_s14, 512, %s296_s3, [#allocation5], %s1408_s28, %s1408_s28, %s1409_s25  }
  0x22   : > { %s348_s23 = sshll.u32 %s1730_s9, 4  ;;  %s350_s30 = sshll.u32 %s1412_s21, 4  ;;  %s349_s23 = int_to_ptr.hbm [resolvable:$true] %s348_s23  ;;  %s351_s30 = int_to_ptr.vmem [resolvable:$true] %s350_s30 }
  0x23   : > { %1065 = dma.hbm_to_vmem [thread:$0]  (!%p1548_p13), %s329_s17, 128, %s331_s22, [#allocation8]  }
  0x24   : > { %1068 = dma.hbm_to_vmem [thread:$0]  (!%p1548_p13), %s349_s23, 512, %s351_s30, [#allocation11], %s1408_s28, %s1408_s28, %s1409_s25  }
  0x25   : > { %369 = sbr.rel (%p1533_p10) target bundleno = 694 (0x2b6), region = 60 }
  0x2a   : > { %1366 = dma.done.wait (%p1537_p11), [#allocation5], 512  }
  0x2b   : > { %1368 = vsyncadd (%p1537_p11), [#allocation5], 4294966784 }
  0x2c   : > { %1370 = dma.done.wait (%p1537_p11), [#allocation8], 640  }
  0x2d   : > { %1372 = vsyncadd (%p1537_p11), [#allocation8], 4294966656 }
  0x2e   : > { %1374 = dma.done.wait (%p1537_p11), [#allocation11], 512  }
  0x2f   : > { %1376 = vsyncadd (%p1537_p11), [#allocation11], 4294966784  ;;  %s415_s3 = sand.u32 1, %s1389_s18   ;;  %s1006_s11 = sshll.u32 %s1397_s20, 5 }
  0x30   : > { %s1005_s17 = sshll.u32 %s415_s3, 4  ;;  %s422_s25 = scalar_lea.hbm %s1721_s0, %s1006_s11 }
  0x31   : > { %s430_s29 = sshll.u32 %s422_s25, 4  ;;  %s1413_s12 = smov [#allocation2]   ;;  %s431_s29 = int_to_ptr.hbm [resolvable:$true] %s430_s29 }
  0x32   : > { %s432_s24 = sshll.u32 %s1413_s12, 4  ;;  %s1289_s28 = sshra.s32 %s431_s29, 4  ;;  %s433_s24 = int_to_ptr.vmem [resolvable:$true] %s432_s24  ;;  %s1290_s28 = int_to_ptr.hbm [resolvable:$true] %s1289_s28 }
  0x33   : > { %s1291_s13 = scalar_lea.hbm %s1290_s28, 32  ;;  %s1293_s26 = scalar_lea.hbm %s1721_s0, 64 }
  0x34   : > { %p1292_p0 = scmp.ne.s32.totalorder %s1290_s28, %s1291_s13  ;;  %p1294_p1 = scmp.lt.s32.totalorder %s1290_s28, %s1721_s0 }
  0x35   : > { %p1295_p2 = scmp.lt.s32.totalorder %s1293_s26, %s1291_s13 }
  0x37   : > { %p1296_p3 = por %p1295_p2, %p1294_p1 }
  0x39   : > { %p1297_p5 = pnand %p1296_p3, %p1292_p0 }
  0x3b   : > { %1300 = shalt.err (!%p1297_p5)  }
  0x3c   : > { %435 = dma.hbm_to_vmem [thread:$0]  %s431_s29, 512, %s433_s24, [#allocation3] }
  0x3d   : > { %s1596_s21 = scalar_lea.vmem [#allocation12], %s1005_s17 }
  0x3e   : > { %1377 = dma.done.wait [#allocation3], 512 }
  0x3f   : > { %1378 = vsyncadd [#allocation3], 4294966784  ;;  %v496_v0 = vld [vmem:[#allocation7 + $0x18] sm:$0xff]  ;;  %v495_v1 = vld [vmem:[#allocation7 + $0x10] sm:$0xff]  ;;  %vm451_vm0 = vcmask 261120   ;;  %v610_v24 = vlaneseq  ;;  %v1414_v35 = vmov 0.0  }
  0x40   : > { %1034 = vmatpush.msra.mxu1 %v496_v0  ;;  %v494_v2 = vld [vmem:[#allocation7 + $0x8] sm:$0xff]  ;;  %v446_v3 = vld [vmem:[#allocation4 + $0x18] sm:$0xff]  ;;  %v445_v4 = vld [vmem:[#allocation4 + $0x10] sm:$0xff]  ;;  %v646_v36 = vrot.slane %v1414_v35, 5  ;;  %v655_v40 = vrot.slane %v1414_v35, 6  ;;  %v666_v43 = vrot.slane %v1414_v35, 7 }
  0x41   : > { %v493_v5 = vld [vmem:[#allocation7] sm:$0xff]  ;;  %1030 = vmatpush.msra.mxu3 %v446_v3  ;;  %v444_v6 = vld [vmem:[#allocation4 + $0x8] sm:$0xff]  ;;  %476 = vmatpush.msra.mxu0 %v446_v3  ;;  %v441_v9 = vld [vmem:[#allocation2 + $0x10] sm:$0xff]  ;;  %v1608_v30 = vshrl.u32 %v610_v24, 7  ;;  %s1029_s15 = sshll.u32 %s1397_s20, 4  ;;  %s1756_s23 = sld [smem:[#allocation30_spill]] }
  0x42   : > { %1035 = vmatpush.msra.mxu1 %v495_v1  ;;  %v440_v7 = vld [vmem:[#allocation2 + $0x8] sm:$0xff]  ;;  %v443_v8 = vld [vmem:[#allocation4] sm:$0xff]  ;;  %s878_s11 = sshll.u32 %s1596_s21, 4  ;;  %s864_s19 = scalar_lea.sflag [#allocation6], %s415_s3  ;;  %s879_s11 = int_to_ptr.vmem [resolvable:$true] %s878_s11 }
  0x43   : > { %1031 = vmatpush.msra.mxu3 %v445_v4  ;;  %477 = vmatpush.msra.mxu0 %v445_v4  ;;  %v1141_v10 = vld [vmem:[%s1725_s4] ss:$0 sm:$0xff]  ;;  %vm649_vm5 = vcmp.lt.s32.totalorder %v1608_v30, 3  ;;  %vm658_vm6 = vcmp.lt.s32.totalorder %v1608_v30, 2  ;;  %vm669_vm8 = vcmp.lt.s32.totalorder %v1608_v30, 1  ;;  %vm685_vm12 = vcmp.lt.s32.totalorder %v1608_v30, 7 }
  0x44   : > { %1036 = vmatpush.msra.mxu1 %v494_v2  ;;  %v1142_v25 = vld [vmem:[%s1723_s2] ss:$0 sm:$0xff]  ;;  %vm696_vm13 = vcmp.lt.s32.totalorder %v1608_v30, 6  ;;  %vm707_vm14 = vcmp.lt.s32.totalorder %v1608_v30, 5 }
  0x45   : > { %1032 = vmatpush.msra.mxu3 %v444_v6  ;;  %478 = vmatpush.msra.mxu0 %v444_v6  ;;  %v1611_v39 = vld [vmem:[#allocation9] sm:$0x7f] }
  0x46   : > { %1037 = vmatpush.msra.mxu1 %v493_v5  ;;  %v652_v42 = vperm.slane %v1611_v39, 0  ;;  %v661_v47 = vperm.slane %v1611_v39, 1  ;;  %v672_v55 = vperm.slane %v1611_v39, 2  ;;  %v677_v3 = vperm.slane %v1611_v39, 3 }
  0x47   : > { %1012 = vmatmul.msk.f32.vlgmr.msra.gmra.mxu1 %vm451_vm0, %v440_v7  ;;  %1033 = vmatpush.msra.mxu3 %v443_v8  ;;  %s877_s30 = scalar_lea.hbm %s1756_s23, %s1029_s15  ;;  %s1333_s12 = scalar_lea.hbm %s1756_s23, 32 }
  0x48   : > { %1008 = vmatmul.msk.f32.vlgmr.msra.gmra.mxu3 %vm451_vm0, %v440_v7  ;;  %479 = vmatpush.msra.mxu0 %v443_v8  ;;  %s880_s17 = sshll.u32 %s877_s30, 4  ;;  %s881_s17 = int_to_ptr.hbm [resolvable:$true] %s880_s17 }
  0x49   : > { %s1327_s20 = sshra.s32 %s881_s17, 4  ;;  %s1328_s20 = int_to_ptr.hbm [resolvable:$true] %s1327_s20 }
  0x4a   : > { %513 = vmatpush.msrb.mxu0 %v496_v0  ;;  %s1329_s22 = scalar_lea.hbm %s1328_s20, 16  ;;  %p1334_p10 = scmp.lt.s32.totalorder %s1328_s20, %s1756_s23 }
  0x4b   : > { %p1330_p6 = scmp.ne.s32.totalorder %s1328_s20, %s1329_s22  ;;  %p1335_p11 = scmp.lt.s32.totalorder %s1333_s12, %s1329_s22 }
  0x4c   : > { %514 = vmatpush.msrb.mxu0 %v495_v1 }
  0x4d   : > { %p1331_p7 = pnand %p1330_p6, %p1518_p4  ;;  %p1336_p12 = por %p1335_p11, %p1334_p10 }
  0x4e   : > { %515 = vmatpush.msrb.mxu0 %v494_v2 }
  0x4f   : > { %1013 = vmatmul.msk.f32.gmra.mxu1 %vm451_vm0, %v441_v9  ;;  %p1332_p9 = pneg %p1331_p7 }
  0x50   : > { %516 = vmatpush.msrb.mxu0 %v493_v5  ;;  %1009 = vmatmul.msk.f32.gmra.mxu3 %vm451_vm0, %v441_v9  ;;  %v688_v5 = vperm.slane %v1611_v39, 4  ;;  %v699_v9 = vperm.slane %v1611_v39, 5 }
  0x51   : > { %p1337_p13 = pnand %p1336_p12, %p1332_p9 }
  0xc4   : > { %v521_v11 = vpop.f32.mrf.mxu1 }
  0xc5   : > { %v522_v12 = vadd.f32 %v1141_v10, %v521_v11 }
  0xc7   : > { %v1016_v13 = vmul.f32 -1.442695, %v522_v12 }
  0xc9   : > { %1147 = vpow2.f32 %v1016_v13 }
  0xcb   : > { %v484_v22 = vpop.f32.mrf.mxu3 }
  0xcc   : > { %v524_v14 = vpop.f32.mrf.mxu1  ;;  %v485_v31 = vadd.f32 %v1142_v25, %v484_v22 }
  0xcd   : > { %v525_v15 = vadd.f32 %v1141_v10, %v524_v14 }
  0xcf   : > { %v1148_v16 = vpop.eup %1147  ;;  %v1017_v17 = vmul.f32 -1.442695, %v525_v15 }
  0xd0   : > { %v543_v18 = vadd.f32 1.0, %v1148_v16 }
  0xd1   : > { %1149 = vpow2.f32 %v1017_v17 }
  0xd2   : > { %1151 = vrcp.f32 %v543_v18  ;;  %v572_v27 = vand.u32 2147483648, %v543_v18  ;;  %v570_v29 = vand.u32 2147483647, %v543_v18  ;;  %vm566_vm2 = vweird.f32 %v543_v18 }
  0xd3   : > { %v487_v45 = vpop.f32.mrf.mxu3 }
  0xd4   : > { %v573_v34 = vor.u32 1.1754944e-38, %v572_v27  ;;  %vm571_vm4 = vcmp.eq.f32.partialorder %v570_v29, 8.507059e+37  ;;  %v488_v54 = vadd.f32 %v1142_v25, %v487_v45 }
  0xd7   : > { %v1150_v19 = vpop.eup %1149 }
  0xd8   : > { %v1152_v20 = vpop.eup %1151  ;;  %v544_v21 = vadd.f32 1.0, %v1150_v19 }
  0xd9   : > { %v562_v23 = vmul.f32 %v1152_v20, %v543_v18  ;;  %vm567_vm1 = vweird.f32 %v1152_v20 }
  0xda   : > { %1153 = vrcp.f32 %v544_v21  ;;  %vm568_vm3 = vmor %vm566_vm2, %vm567_vm1  ;;  %v585_v48 = vand.u32 2147483647, %v544_v21  ;;  %v587_v49 = vand.u32 2147483648, %v544_v21  ;;  %vm581_vm9 = vweird.f32 %v544_v21 }
  0xdb   : > { %v563_v26 = vsub.f32 1.0, %v562_v23  ;;  %v710_v23 = vperm.slane %v1611_v39, 6 }
  0xdc   : > { %v588_v60 = vor.u32 1.1754944e-38, %v587_v49  ;;  %vm586_vm11 = vcmp.eq.f32.partialorder %v585_v48, 8.507059e+37 }
  0xdd   : > { %v564_v28 = vmul.f32 %v1152_v20, %v563_v26 }
  0xdf   : > { %v565_v32 = vadd.f32 %v1152_v20, %v564_v28  ;;  %v684_v28 = vrot.slane %v1414_v35, 1 }
  0xe0   : > { %v1154_v33 = vpop.eup %1153 }
  0xe1   : > { %v569_v37 = vsel %vm568_vm3, %v1152_v20, %v565_v32  ;;  %v577_v38 = vmul.f32 %v1154_v33, %v544_v21  ;;  %vm582_vm7 = vweird.f32 %v1154_v33 }
  0xe2   : > { %v574_v41 = vsel %vm571_vm4, %v573_v34, %v569_v37  ;;  %vm583_vm10 = vmor %vm581_vm9, %vm582_vm7  ;;  %v1143_v37 = vld [vmem:[%s1727_s6] ss:$0 sm:$0xff] }
  0xe3   : > { %v607_v44 = vmul.f32 %v574_v41, %v485_v31  ;;  %v578_v46 = vsub.f32 1.0, %v577_v38  ;;  %v706_v41 = vrot.slane %v1414_v35, 3 }
  0xe5   : > { %v579_v50 = vmul.f32 %v1154_v33, %v578_v46  ;;  %v647_v51 = vrot.slane %v607_v44, 5  ;;  %v656_v52 = vrot.slane %v607_v44, 6  ;;  %v667_v53 = vrot.slane %v607_v44, 7 }
  0xe6   : > { %v682_v7 = vrot.slane %v607_v44, 1  ;;  %v693_v8 = vrot.slane %v607_v44, 2  ;;  %v678_v14 = vmul.f32 %v677_v3, %v607_v44  ;;  %v704_v19 = vrot.slane %v607_v44, 3 }
  0xe7   : > { %v580_v56 = vadd.f32 %v1154_v33, %v579_v50  ;;  %v651_v57 = vsel %vm649_vm5, %v646_v36, %v647_v51  ;;  %v660_v58 = vsel %vm658_vm6, %v655_v40, %v656_v52  ;;  %v671_v59 = vsel %vm669_vm8, %v666_v43, %v667_v53 }
  0xe8   : > { %v653_v61 = vmul.f32 %v652_v42, %v651_v57  ;;  %v662_v62 = vmul.f32 %v661_v47, %v660_v58  ;;  %v673_v2 = vmul.f32 %v672_v55, %v671_v59  ;;  %v1415_v57 = vmov 32.0  }
  0xe9   : > { %v584_v63 = vsel %vm583_vm10, %v1154_v33, %v580_v56  ;;  %v695_v33 = vrot.slane %v1414_v35, 2  ;;  %1155 = vrcp.f32 %v1415_v57 }
  0xea   : > { %v589_v0 = vsel %vm586_vm11, %v588_v60, %v584_v63  ;;  %v664_v1 = vadd.f32 %v662_v62, %v653_v61 }
  0xeb   : > { %v608_v4 = vmul.f32 %v589_v0, %v488_v54 }
  0xec   : > { %v675_v6 = vadd.f32 %v673_v2, %v664_v1 }
  0xed   : > { %v683_v10 = vrot.slane %v608_v4, 1  ;;  %v694_v11 = vrot.slane %v608_v4, 2  ;;  %v705_v12 = vrot.slane %v608_v4, 3  ;;  %v648_v13 = vrot.slane %v608_v4, 5 }
  0xee   : > { %v657_v15 = vrot.slane %v608_v4, 6  ;;  %v668_v16 = vrot.slane %v608_v4, 7  ;;  %v680_v21 = vadd.f32 %v678_v14, %v675_v6  ;;  %v679_v44 = vmul.f32 %v677_v3, %v608_v4 }
  0xef   : > { %v687_v17 = vsel %vm685_vm12, %v682_v7, %v683_v10  ;;  %v698_v18 = vsel %vm696_vm13, %v693_v8, %v694_v11  ;;  %v650_v20 = vsel %vm649_vm5, %v647_v51, %v648_v13  ;;  %v709_v25 = vsel %vm707_vm14, %v704_v19, %v705_v12  ;;  %v1156_v58 = vpop.eup %1155  ;;  %v825_v13 = vld [vmem:[#allocation10 + $0x8] sm:$0xff] }
  0xf0   : > { %v689_v22 = vmul.f32 %v688_v5, %v687_v17  ;;  %v654_v24 = vmul.f32 %v652_v42, %v650_v20  ;;  %v659_v26 = vsel %vm658_vm6, %v656_v52, %v657_v15  ;;  %v670_v27 = vsel %vm669_vm8, %v667_v53, %v668_v16  ;;  %v824_v15 = vld [vmem:[#allocation10] sm:$0xff] }
  0xf1   : > { %v700_v31 = vmul.f32 %v699_v9, %v698_v18  ;;  %v663_v32 = vmul.f32 %v661_v47, %v659_v26  ;;  %v711_v36 = vmul.f32 %v710_v23, %v709_v25  ;;  %v674_v39 = vmul.f32 %v672_v55, %v670_v27  ;;  %v1144_v27 = vld [vmem:[%s1728_s7] ss:$0 sm:$0xff] }
  0xf2   : > { %v691_v29 = vadd.f32 %v689_v22, %v680_v21  ;;  %v686_v40 = vsel %vm685_vm12, %v683_v10, %v684_v28  ;;  %v697_v45 = vsel %vm696_vm13, %v694_v11, %v695_v33  ;;  %v708_v49 = vsel %vm707_vm14, %v705_v12, %v706_v41  ;;  %v826_v10 = vld [vmem:[#allocation10 + $0x10] sm:$0xff] }
  0xf3   : > { %v665_v38 = vadd.f32 %v663_v32, %v654_v24  ;;  %v690_v48 = vmul.f32 %v688_v5, %v686_v40  ;;  %v701_v52 = vmul.f32 %v699_v9, %v697_v45  ;;  %v712_v54 = vmul.f32 %v710_v23, %v708_v49  ;;  %v827_v9 = vld [vmem:[#allocation10 + $0x18] sm:$0xff]  ;;  %v442_v45 = vld [vmem:[#allocation2 + $0x18] sm:$0xff] }
  0xf4   : > { %v702_v34 = vadd.f32 %v700_v31, %v691_v29  ;;  %v728_v59 = vmul.f32 32.0, %v1156_v58  ;;  %vm732_vm15 = vweird.f32 %v1156_v58  ;;  %850 = vmatpush.msra.mxu2 %v827_v9  ;;  %v1145_v32 = vld [vmem:[%s1729_s8] ss:$0 sm:$0xff]  ;;  %1010 = vmatmul.msk.f32.gmra.mxu3 %vm451_vm0, %v442_v45 }
  0xf5   : > { %v676_v43 = vadd.f32 %v674_v39, %v665_v38  ;;  %1014 = vmatmul.msk.f32.gmra.mxu1 %vm451_vm0, %v442_v45 }
  0xf6   : > { %v713_v42 = vadd.f32 %v711_v36, %v702_v34  ;;  %v729_v60 = vsub.f32 1.0, %v728_v59  ;;  %851 = vmatpush.msra.mxu2 %v826_v10 }
  0xf7   : > { %v681_v47 = vadd.f32 %v679_v44, %v676_v43  ;;  %v439_v44 = vld [vmem:[#allocation2] sm:$0xff] }
  0xf8   : > { %v719_v46 = vadd.f32 %v1143_v37, %v713_v42  ;;  %v730_v61 = vmul.f32 %v1156_v58, %v729_v60  ;;  %852 = vmatpush.msra.mxu2 %v825_v13  ;;  %1007 = vmatmul.msk.f32.vlgmr.msra.gmra.mxu0 %vm451_vm0, %v439_v44 }
  0xf9   : > { %v692_v51 = vadd.f32 %v690_v48, %v681_v47 }
  0xfa   : > { %v721_v50 = vsel %vm451_vm0, %v719_v46, 0.0  ;;  %v731_v30 = vadd.f32 %v1156_v58, %v730_v61  ;;  %853 = vmatpush.msra.mxu2 %v824_v15 }
  0xfb   : > { %722 = vadd.xlane.f32.xlu0 %v721_v50  ;;  %v703_v53 = vadd.f32 %v701_v52, %v692_v51 }
  0xfc   : > { %v733_v62 = vsel %vm732_vm15, %v1156_v58, %v731_v30 }
  0xfd   : > { %v714_v35 = vadd.f32 %v712_v54, %v703_v53 }
  0xff   : > { %v720_v55 = vadd.f32 %v1143_v37, %v714_v35 }
 0x100   : > { %1011 = vmatmul.msk.f32.vlgmr.msrb.gmra.mxu0 %vm451_vm0, %v439_v44 }
 0x101   : > { %v724_v56 = vsel %vm451_vm0, %v720_v55, 0.0 }
 0x103   : > { %725 = vadd.xlane.f32.xlu0 %v724_v56 }
 0x16e   : > { %v723_v63 = vpop.xlane.xlu0 %722 }
 0x16f   : > { %v734_v0 = vmul.f32 %v733_v62, %v723_v63 }
 0x171   : > { %v736_v1 = vsub.f32 %v719_v46, %v734_v0 }
 0x173   : > { %v738_v2 = vmul.f32 %v736_v1, %v736_v1 }
 0x175   : > { %v740_v3 = vsel %vm451_vm0, %v738_v2, 0.0 }
 0x176   : > { %741 = vadd.xlane.f32.xlu1 %v740_v3  ;;  %v726_v4 = vpop.xlane.xlu0 %725 }
 0x177   : > { %v735_v5 = vmul.f32 %v733_v62, %v726_v4  ;;  %v490_v9 = vpop.f32.mrf.mxu3 }
 0x179   : > { %v737_v6 = vsub.f32 %v720_v55, %v735_v5 }
 0x17b   : > { %v739_v7 = vmul.f32 %v737_v6, %v737_v6 }
 0x17d   : > { %v743_v8 = vsel %vm451_vm0, %v739_v7, 0.0  ;;  %v481_v7 = vpop.f32.mrf.mxu0 }
 0x17e   : > { %744 = vadd.xlane.f32.xlu1 %v743_v8  ;;  %v527_v8 = vpop.f32.mrf.mxu1 }
 0x185   : > { %v518_v10 = vpop.f32.mrf.mxu0 }
 0x1e9   : > { %v742_v11 = vpop.xlane.xlu1 %741 }
 0x1ea   : > { %v746_v12 = vmul.f32 %v742_v11, %v733_v62  ;;  %v1146_v11 = vld [vmem:[%s1731_s10] ss:$0 sm:$0xff] }
 0x1ec   : > { %v748_v14 = vadd.f32 1e-05, %v746_v12 }
 0x1ee   : > { %1157 = vrsqrt.f32 %v748_v14  ;;  %vm756_vm2 = vweird.f32 %v748_v14 }
 0x1f1   : > { %v745_v16 = vpop.xlane.xlu1 %744 }
 0x1f2   : > { %v747_v17 = vmul.f32 %v745_v16, %v733_v62 }
 0x1f4   : > { %v1158_v18 = vpop.eup %1157  ;;  %v749_v19 = vadd.f32 1e-05, %v747_v17 }
 0x1f5   : > { %v751_v20 = vmul.f32 %v1158_v18, %v748_v14  ;;  %vm757_vm1 = vweird.f32 %v1158_v18 }
 0x1f6   : > { %1159 = vrsqrt.f32 %v749_v19  ;;  %vm758_vm3 = vmor %vm756_vm2, %vm757_vm1  ;;  %vm766_vm5 = vweird.f32 %v749_v19 }
 0x1f7   : > { %v752_v21 = vmul.f32 %v1158_v18, %v751_v20 }
 0x1f9   : > { %v753_v22 = vmul.f32 0.5, %v752_v21 }
 0x1fb   : > { %v754_v23 = vsub.f32 1.5, %v753_v22 }
 0x1fc   : > { %v1160_v24 = vpop.eup %1159 }
 0x1fd   : > { %v755_v25 = vmul.f32 %v1158_v18, %v754_v23  ;;  %v761_v26 = vmul.f32 %v1160_v24, %v749_v19  ;;  %vm767_vm4 = vweird.f32 %v1160_v24 }
 0x1fe   : > { %vm768_vm6 = vmor %vm766_vm5, %vm767_vm4 }
 0x1ff   : > { %v759_v28 = vsel %vm758_vm3, %v1158_v18, %v755_v25  ;;  %v762_v29 = vmul.f32 %v1160_v24, %v761_v26 }
 0x200   : > { %v770_v31 = vmul.f32 %v759_v28, %v736_v1 }
 0x201   : > { %v763_v33 = vmul.f32 0.5, %v762_v29 }
 0x202   : > { %v776_v34 = vmul.f32 %v1144_v27, %v770_v31 }
 0x203   : > { %v764_v36 = vsub.f32 1.5, %v763_v33 }
 0x204   : > { %v782_v37 = vadd.f32 %v1145_v32, %v776_v34 }
 0x205   : > { %v765_v38 = vmul.f32 %v1160_v24, %v764_v36 }
 0x206   : > { %v1019_v39 = vmul.f32 -1.442695, %v782_v37 }
 0x207   : > { %v769_v40 = vsel %vm768_vm6, %v1160_v24, %v765_v38 }
 0x208   : > { %v771_v41 = vmul.f32 %v769_v40, %v737_v6  ;;  %1161 = vpow2.f32 %v1019_v39 }
 0x20a   : > { %v777_v42 = vmul.f32 %v1144_v27, %v771_v41 }
 0x20c   : > { %v783_v43 = vadd.f32 %v1145_v32, %v777_v42 }
 0x20e   : > { %v1162_v46 = vpop.eup %1161  ;;  %v1020_v47 = vmul.f32 -1.442695, %v783_v43 }
 0x20f   : > { %v790_v48 = vadd.f32 1.0, %v1162_v46 }
 0x210   : > { %1163 = vpow2.f32 %v1020_v47 }
 0x211   : > { %1165 = vrcp.f32 %v790_v48  ;;  %v803_v54 = vand.u32 2147483648, %v790_v48  ;;  %v801_v55 = vand.u32 2147483647, %v790_v48  ;;  %vm797_vm8 = vweird.f32 %v790_v48 }
 0x213   : > { %v804_v58 = vor.u32 1.1754944e-38, %v803_v54  ;;  %vm802_vm10 = vcmp.eq.f32.partialorder %v801_v55, 8.507059e+37 }
 0x216   : > { %v1164_v49 = vpop.eup %1163 }
 0x217   : > { %v1166_v50 = vpop.eup %1165  ;;  %v791_v51 = vadd.f32 1.0, %v1164_v49 }
 0x218   : > { %v793_v52 = vmul.f32 %v1166_v50, %v790_v48  ;;  %vm798_vm7 = vweird.f32 %v1166_v50 }
 0x219   : > { %1167 = vrcp.f32 %v791_v51  ;;  %vm799_vm9 = vmor %vm797_vm8, %vm798_vm7  ;;  %v818_v63 = vand.u32 2147483648, %v791_v51  ;;  %v816_v1 = vand.u32 2147483647, %v791_v51  ;;  %vm812_vm12 = vweird.f32 %v791_v51 }
 0x21a   : > { %v794_v53 = vsub.f32 1.0, %v793_v52 }
 0x21b   : > { %v819_v3 = vor.u32 1.1754944e-38, %v818_v63  ;;  %vm817_vm14 = vcmp.eq.f32.partialorder %v816_v1, 8.507059e+37 }
 0x21c   : > { %v795_v35 = vmul.f32 %v1166_v50, %v794_v53 }
 0x21e   : > { %v796_v56 = vadd.f32 %v1166_v50, %v795_v35 }
 0x21f   : > { %v1168_v57 = vpop.eup %1167 }
 0x220   : > { %v800_v59 = vsel %vm799_vm9, %v1166_v50, %v796_v56  ;;  %v808_v60 = vmul.f32 %v1168_v57, %v791_v51  ;;  %vm813_vm11 = vweird.f32 %v1168_v57 }
 0x221   : > { %v805_v61 = vsel %vm802_vm10, %v804_v58, %v800_v59  ;;  %vm814_vm13 = vmor %vm812_vm12, %vm813_vm11 }
 0x222   : > { %v822_v30 = vmul.f32 %v805_v61, %v782_v37  ;;  %v809_v62 = vsub.f32 1.0, %v808_v60 }
 0x224   : > { %1021 = vmatmul.msk.f32.vlgmr.msra.gmra.mxu2 %vm451_vm0, %v822_v30  ;;  %v810_v0 = vmul.f32 %v1168_v57, %v809_v62 }
 0x226   : > { %v811_v2 = vadd.f32 %v1168_v57, %v810_v0 }
 0x228   : > { %v815_v4 = vsel %vm814_vm13, %v1168_v57, %v811_v2 }
 0x229   : > { %v820_v5 = vsel %vm817_vm14, %v819_v3, %v815_v4 }
 0x22a   : > { %v823_v6 = vmul.f32 %v820_v5, %v783_v43 }
 0x22c   : > { %1022 = vmatmul.msk.f32.gmra.mxu2 %vm451_vm0, %v823_v6 }
 0x2a7   : > { %v855_v12 = vpop.f32.mrf.mxu2 }
 0x2a8   : > { %v856_v13 = vadd.f32 %v1146_v11, %v855_v12 }
 0x2aa   : > { %861 = vst.msk [vmem:[%s1596_s21] sm:$0xff] %vm451_vm0, %v856_v13 }
 0x2af   : > { %v858_v14 = vpop.f32.mrf.mxu2 }
 0x2b0   : > { %v859_v15 = vadd.f32 %v1146_v11, %v858_v14 }
 0x2b2   : > { %862 = vst.msk [vmem:[%s1596_s21 + $0x8] sm:$0xff] %vm451_vm0, %v859_v15 }
 0x2b3   : > { %1340 = shalt.err (!%p1337_p13)
}
 0x2b4   : > { %s1416_s3 = smov 128   ;;  %s1417_s21 = smov 8  }
 0x2b5   : > { %1054 = dma.vmem_to_hbm [thread:$0]  (%p1518_p4), %s879_s11, 256, %s881_s17, %s864_s19, %s1416_s3, %s1416_s3, %s1417_s21  }
 0x2b6 PF: > { %s1757_s13 = sld [smem:[#allocation25_spill]] }
 0x2b7   : > { %s1758_s14 = sld [smem:[#allocation22_spill]] }
 0x2bc   : > { %p1081_p0 = scmp.ge.s32.totalorder %s1757_s13, 2 }
 0x2bd   : > { %s895_s26 = sand.u32 1, %s1758_s14  }
 0x2be   : > { %p1070_p1 = pnand %p1081_p0, %p1525_p8  ;;  %s896_s16 = scalar_lea.sflag [#allocation6], %s895_s26 }
 0x2c0   : > { %p1071_p2 = pneg %p1070_p1 }
 0x2c2   : > { %1380 = dma.done.wait (%p1071_p2), %s896_s16, 256  }
 0x2c3   : > { %1382 = vsyncadd (%p1071_p2), %s896_s16, 4294967040  ;;  %s27_s22 = sadd.s32 1, %s1757_s13   ;;  %s1760_s30 = sld [smem:[#allocation23_spill]] }
 0x2c4   : > { %p24_p3 = scmp.ge.s32.totalorder %s27_s22, 4   ;;  %s1761_s19 = sld [smem:[#allocation28_spill]] }
 0x2c5   : > { %s1762_s20 = sld [smem:[#allocation24_spill]]  ;;  %s1764_s17 = smov %s1389_s18 }
 0x2c6   : > { %s1763_s21 = sld [smem:[#allocation26_spill]]  ;;  %26 = sbr.rel (!%p24_p3) target bundleno = 10 (0xa), region = 114 }
 0x2c9   : > { %s1765_s18 = smov %s1760_s30 }
 0x2cb   :  { %902 = vsyncpa [#allocation5], 1 }
 0x2cc   :  { %904 = vsyncpa [#allocation5 + $0x1], 1 }
 0x2cd   :  { %905 = vsyncpa [#allocation8], 1 }
 0x2ce   :  { %906 = vsyncpa [#allocation11], 1 }
 0x2cf   :  { %907 = vsyncpa [#allocation6], 1 }
 0x2d0   :  { %909 = vsyncpa [#allocation6 + $0x1], 1 }
 0x2d1   :  { %910 = vsyncmov [#allocation3] }
 0x2d4   :  { %s911_s27 = vpop.sfrf %910 }
 0x2d5   :  { %p1028_p4 = scmp.ne.s32.totalorder %s911_s27, 0 }
 0x2d7   :  { %915 = shalt.err (%p1028_p4)  }

</bundles_post_ra>
